<compile_context>
chip_gen: v5e
topology: v5e:2x2
jax: 0.10.0
libtpu: 0.0.40
codegen_flags: <defaults>
</compile_context>

<pallas_src>
import math
from functools import partial

import jax
import jax.numpy as jnp
from jax.experimental import pallas as pl
from jax.experimental.pallas import tpu as pltpu


_EPS = 1e-5  # torch.nn.LayerNorm default


# --------------------------------------------------------------------------- #
# Kernels
# --------------------------------------------------------------------------- #
def _layer_norm_over_sublanes(x, g, b, eps):
    """LayerNorm over the sublane axis of a (C, TN) f32 tile (C = embed_dim).

    Stats are computed while C is still the sublane axis so every VPU op and
    reduction stays lane-dense even when C < 128.  Two-pass (mean, then
    centered variance) for numerical robustness; biased variance like torch.
    """
    mean = jnp.mean(x, axis=0, keepdims=True)          # (1, TN)
    xc = x - mean
    var = jnp.mean(xc * xc, axis=0, keepdims=True)     # (1, TN), biased
    inv = jax.lax.rsqrt(var + eps)
    return (xc * inv) * g + b                          # (C, TN)


def _pack_store(y, o_ref, w_ref, k):
    """Store y (C, TN) transposed & lane-packed into o_ref (1, TN//k, k*C).

    w_ref is a (TN, C) VMEM staging tile.  k consecutive tokens are packed
    into one (k*C >= 128)-lane output row via sublane-strided reads, so the
    output block is lane-dense (no masked vst / 4x-padded output buffer).
    """
    w_ref[...] = y.T.astype(w_ref.dtype)               # (TN, C) staging
    r = o_ref.shape[1]                                 # TN // k
    parts = [w_ref[pl.ds(j, r, stride=k), :] for j in range(k)]   # each (R, C)
    o_ref[0] = jnp.concatenate(parts, axis=-1).astype(o_ref.dtype)


def _norm_packed_kernel(x_ref, g_ref, b_ref, o_ref, w_ref, *, k, eps):
    # x_ref: (1, C, TN)  g/b: (C, 1)  o_ref: (1, TN//k, k*C)  w_ref: (TN, C)
    x = x_ref[0].astype(jnp.float32)
    y = _layer_norm_over_sublanes(
        x, g_ref[...].astype(jnp.float32), b_ref[...].astype(jnp.float32), eps)
    _pack_store(y, o_ref, w_ref, k)


def _norm_unpacked_kernel(x_ref, g_ref, b_ref, o_ref, *, eps):
    # Fallback when lane-packing constraints are not met. o_ref: (1, TN, C).
    x = x_ref[0].astype(jnp.float32)
    y = _layer_norm_over_sublanes(
        x, g_ref[...].astype(jnp.float32), b_ref[...].astype(jnp.float32), eps)
    o_ref[0] = y.T.astype(o_ref.dtype)


def _plain_packed_kernel(x_ref, o_ref, w_ref, *, k):
    # norm_layer=None path: flatten + transpose only (lane-packed output).
    _pack_store(x_ref[0], o_ref, w_ref, k)


def _plain_unpacked_kernel(x_ref, o_ref):
    o_ref[0] = x_ref[0].T.astype(o_ref.dtype)


# --------------------------------------------------------------------------- #
# Tiling / VMEM sizing helpers
# --------------------------------------------------------------------------- #
def _vmem_cap_bytes():
    """Physical VMEM with 25% headroom; falls back to 48 MiB if unknown."""
    cap = 64 << 20
    try:
        info = pltpu.get_tpu_info()
        cap = int(getattr(info, "vmem_capacity_bytes", cap))
    except Exception:
        pass
    return (cap * 3) // 4


def _choose_tile_n(n, c, itemsize, k, batch,
                   max_block_bytes=1 << 20, min_programs=4):
    """Largest multiple-of-128 divisor of n whose (C, tile_n) input block fits
    the byte budget (HBM-bandwidth-bound kernel wants ~0.5-1 MiB blocks),
    preferring choices that keep >= min_programs grid steps for megacore
    sharding and pipeline depth."""
    cands = [t for t in range(128, n + 1, 128) if n % t == 0]
    good = [t for t in cands
            if c * t * itemsize <= max_block_bytes and (t // k) % 8 == 0]
    if good:
        occ = [t for t in good if batch * (n // t) >= min_programs]
        return max(occ) if occ else max(good)
    if cands:
        return min(cands)
    # TODO(synk): for large N with no multiple-of-128 divisor, pad N (or use a
    # masked cdiv grid) instead of this single full-extent tile.
    return n


def _vmem_limit_bytes(c, tile_n, k, itemsize):
    in_blk = c * tile_n * itemsize
    out_blk = tile_n * c * itemsize
    lane_pad = -(-c // 128) * 128                       # padded lanes of (TN, C)
    scratch = tile_n * lane_pad * itemsize if k > 1 else 0
    f32_tmp = 3 * c * tile_n * 4 + (tile_n * lane_pad * 4 if k > 1 else 0)
    need = 2 * (in_blk + out_blk) + scratch + f32_tmp   # x2 = double buffering
    return int(min(_vmem_cap_bytes(), max(need + (8 << 20), 16 << 20)))


# --------------------------------------------------------------------------- #
# Wrapper
# --------------------------------------------------------------------------- #
def patch_embed_forward(x, gamma=None, beta=None, *, tile_n=None, eps=_EPS):
    """x: (B, C, D, H, W) -> (B, D*H*W, C).  If gamma/beta are given, applies
    LayerNorm over C (embed_dim), matching norm_layer=nn.LayerNorm."""
    assert (gamma is None) == (beta is None)
    B, C, D, H, W = x.shape
    N = D * H * W
    x2 = x.reshape(B, C, N)                             # metadata-only reshape

    # Lane-pack factor: k consecutive tokens share one (k*C)-lane output row,
    # with k*C a multiple of 128.  k == 1 when C is already a multiple of 128.
    k = 128 // math.gcd(C, 128)

    itemsize = jnp.dtype(x.dtype).itemsize
    if tile_n is None:
        tile_n = _choose_tile_n(N, C, itemsize, k, B)
    assert N % tile_n == 0, "tile_n must divide N = D*H*W"

    packed = (k > 1 and N % k == 0 and tile_n % k == 0
              and ((tile_n // k) % 8 == 0 or tile_n == N))

    grid = (B, N // tile_n)
    in_spec = pl.BlockSpec((1, C, tile_n), lambda b, n: (b, 0, n))
    cparams = pltpu.CompilerParams(
        dimension_semantics=("parallel", "parallel"),
        vmem_limit_bytes=_vmem_limit_bytes(C, tile_n, k if packed else 1,
                                           itemsize),
    )

    if packed:
        # (B, N, C) viewed as (B, N//k, k*C): pure metadata reshape since each
        # (b, token-tile) output region is contiguous in HBM.
        out_shape = jax.ShapeDtypeStruct((B, N // k, k * C), x.dtype)
        out_spec = pl.BlockSpec((1, tile_n // k, k * C), lambda b, n: (b, n, 0))
        scratch = [pltpu.VMEM((tile_n, C), x.dtype)]
    else:
        out_shape = jax.ShapeDtypeStruct((B, N, C), x.dtype)
        out_spec = pl.BlockSpec((1, tile_n, C), lambda b, n: (b, n, 0))
        scratch = []

    if gamma is None:
        kernel = (partial(_plain_packed_kernel, k=k) if packed
                  else _plain_unpacked_kernel)
        operands = (x2,)
        in_specs = [in_spec]
    else:
        kernel = (partial(_norm_packed_kernel, k=k, eps=eps) if packed
                  else partial(_norm_unpacked_kernel, eps=eps))
        # Params shaped (C, 1) so they broadcast along the token (lane) axis.
        param_spec = pl.BlockSpec((C, 1), lambda b, n: (0, 0))
        operands = (x2, gamma.reshape(C, 1), beta.reshape(C, 1))
        in_specs = [in_spec, param_spec, param_spec]

    out = pl.pallas_call(
        kernel,
        out_shape=out_shape,
        grid=grid,
        in_specs=in_specs,
        out_specs=out_spec,
        scratch_shapes=scratch,
        compiler_params=cparams,
    )(*operands)

    if packed:
        out = out.reshape(B, N, C)                      # metadata-only reshape
    return out


# --------------------------------------------------------------------------- #
# Pure-JAX reference (mirrors the PyTorch module)
# --------------------------------------------------------------------------- #
def patch_embed_ref(x, gamma=None, beta=None, eps=_EPS):
    B, C = x.shape[0], x.shape[1]
    y = x.reshape(B, C, -1).transpose(0, 2, 1)          # (B, N, C)
    if gamma is not None:
        yf = y.astype(jnp.float32)
        mean = jnp.mean(yf, axis=-1, keepdims=True)
        var = jnp.mean((yf - mean) ** 2, axis=-1, keepdims=True)
        yf = (yf - mean) / jnp.sqrt(var + eps)
        y = (yf * gamma + beta).astype(x.dtype)
    return y


if __name__ == "__main__":
    key = jax.random.PRNGKey(0)
    kx, kg, kb = jax.random.split(key, 3)

    # Small shapes consistent with the module: B=2, embed_dim(C)=32, N=128.
    B, C, D, H, W = 2, 32, 4, 4, 8
    x = jax.random.normal(kx, (B, C, D, H, W), dtype=jnp.float32)
    gamma = 1.0 + 0.01 * jax.random.normal(kg, (C,), dtype=jnp.float32)
    beta = 0.01 * jax.random.normal(kb, (C,), dtype=jnp.float32)

    # 1) LayerNorm path, auto tiling, lane-packed output (k = 128 // C = 4).
    out = jax.block_until_ready(patch_embed_forward(x, gamma, beta))
    ref = patch_embed_ref(x, gamma, beta)
    assert out.shape == (B, D * H * W, C)
    assert jnp.allclose(out, ref, atol=1e-4, rtol=1e-4)

    # 2) Multi-tile grid path: N = 512 with explicit tile_n=128 -> grid (2, 4).
    x2 = jax.random.normal(kx, (B, C, 8, 8, 8), dtype=jnp.float32)
    out2 = jax.block_until_ready(patch_embed_forward(x2, gamma, beta, tile_n=128))
    assert jnp.allclose(out2, patch_embed_ref(x2, gamma, beta), atol=1e-4, rtol=1e-4)

    # 3) norm_layer=None (module default): pure flatten + transpose, lane-packed.
    out3 = jax.block_until_ready(patch_embed_forward(x))
    assert jnp.allclose(out3, patch_embed_ref(x))

    # 4) N = 64 (no multiple-of-128 divisor): full-extent tile, still lane-packed.
    x4 = jax.random.normal(kx, (B, C, 4, 4, 4), dtype=jnp.float32)
    out4 = jax.block_until_ready(patch_embed_forward(x4, gamma, beta))
    assert jnp.allclose(out4, patch_embed_ref(x4, gamma, beta), atol=1e-4, rtol=1e-4)

    # 5) N = 30 (not divisible by k=4): exercises the unpacked fallback path.
    x5 = jax.random.normal(kx, (B, C, 2, 3, 5), dtype=jnp.float32)
    out5 = jax.block_until_ready(patch_embed_forward(x5, gamma, beta))
    assert jnp.allclose(out5, patch_embed_ref(x5, gamma, beta), atol=1e-4, rtol=1e-4)

    print("KERNEL_OK")
</pallas_src>

<mosaic_0001>
module attributes {stable_mosaic.version = 11 : i64} {
  func.func @_norm_packed_kernel(%arg0: i32, %arg1: i32, %arg2: memref<1x32x128xf32, #tpu.memory_space<vmem>>, %arg3: memref<32x1xf32, #tpu.memory_space<vmem>>, %arg4: memref<32x1xf32, #tpu.memory_space<vmem>>, %arg5: memref<1x32x128xf32, #tpu.memory_space<vmem>>, %arg6: memref<128x32xf32, #tpu.memory_space<vmem>>) attributes {dimension_semantics = [#tpu.dimension_semantics<parallel>, #tpu.dimension_semantics<parallel>], iteration_bounds = array<i64: 2, 1>, scalar_prefetch = 0 : i64, scratch_operands = 1 : i64, tpu.core_type = #tpu.core_type<tc>, window_params = [{transform_indices = @transform_0, window_bounds = array<i64: 1, 32, 128>}, {pipeline_mode = #tpu.pipeline_mode<synchronous>, transform_indices = @transform_1, window_bounds = array<i64: 32, 1>}, {pipeline_mode = #tpu.pipeline_mode<synchronous>, transform_indices = @transform_2, window_bounds = array<i64: 32, 1>}, {transform_indices = @transform_3, window_bounds = array<i64: 1, 32, 128>}]} {
    %c0 = arith.constant 0 : index
    %c0_0 = arith.constant 0 : index
    %c0_1 = arith.constant 0 : index
    %0 = vector.load %arg2[%c0, %c0_0, %c0_1] : memref<1x32x128xf32, #tpu.memory_space<vmem>>, vector<1x32x128xf32>
    %1 = vector.shape_cast %0 : vector<1x32x128xf32> to vector<32x128xf32>
    %c0_2 = arith.constant 0 : index
    %c0_3 = arith.constant 0 : index
    %2 = vector.load %arg3[%c0_2, %c0_3] : memref<32x1xf32, #tpu.memory_space<vmem>>, vector<32x1xf32>
    %c0_4 = arith.constant 0 : index
    %c0_5 = arith.constant 0 : index
    %3 = vector.load %arg4[%c0_4, %c0_5] : memref<32x1xf32, #tpu.memory_space<vmem>>, vector<32x1xf32>
    %cst = arith.constant dense<0.000000e+00> : vector<128xf32>
    %4 = vector.multi_reduction <add>, %1, %cst [0] : vector<32x128xf32> to vector<128xf32>
    %5 = vector.shape_cast %4 : vector<128xf32> to vector<1x128xf32>
    %cst_6 = arith.constant 3.200000e+01 : f32
    %6 = vector.broadcast %cst_6 : f32 to vector<1x128xf32>
    %7 = arith.divf %5, %6 : vector<1x128xf32>
    %8 = vector.broadcast %7 : vector<1x128xf32> to vector<32x128xf32>
    %9 = arith.subf %1, %8 : vector<32x128xf32>
    %10 = arith.mulf %9, %9 : vector<32x128xf32>
    %cst_7 = arith.constant dense<0.000000e+00> : vector<128xf32>
    %11 = vector.multi_reduction <add>, %10, %cst_7 [0] : vector<32x128xf32> to vector<128xf32>
    %12 = vector.shape_cast %11 : vector<128xf32> to vector<1x128xf32>
    %cst_8 = arith.constant 3.200000e+01 : f32
    %13 = vector.broadcast %cst_8 : f32 to vector<1x128xf32>
    %14 = arith.divf %12, %13 : vector<1x128xf32>
    %cst_9 = arith.constant 9.99999974E-6 : f32
    %15 = vector.broadcast %cst_9 : f32 to vector<1x128xf32>
    %16 = arith.addf %14, %15 : vector<1x128xf32>
    %17 = math.rsqrt %16 : vector<1x128xf32>
    %18 = vector.broadcast %17 : vector<1x128xf32> to vector<32x128xf32>
    %19 = arith.mulf %9, %18 : vector<32x128xf32>
    %20 = vector.broadcast %2 : vector<32x1xf32> to vector<32x128xf32>
    %21 = arith.mulf %19, %20 : vector<32x128xf32>
    %22 = vector.broadcast %3 : vector<32x1xf32> to vector<32x128xf32>
    %23 = arith.addf %21, %22 : vector<32x128xf32>
    %24 = tpu.transpose %23, [1, 0] : vector<32x128xf32> -> vector<128x32xf32>
    %c0_10 = arith.constant 0 : index
    %c0_11 = arith.constant 0 : index
    %25 = vector.load %arg6[%c0_10, %c0_11] : memref<128x32xf32, #tpu.memory_space<vmem>>, vector<128x32xf32>
    tpu.vector_store %arg6[%c0_10, %c0_11], %24 {strides = array<i32>} : memref<128x32xf32, #tpu.memory_space<vmem>>, vector<128x32xf32>,
    %c0_12 = arith.constant 0 : index
    %c0_13 = arith.constant 0 : index
    %26 = tpu.strided_load %arg6[%c0_12, %c0_13] {strides = array<i32: 4, 1>} : memref<128x32xf32, #tpu.memory_space<vmem>>, vector<32x32xf32>
    %c1 = arith.constant 1 : index
    %c0_14 = arith.constant 0 : index
    %27 = tpu.strided_load %arg6[%c1, %c0_14] {strides = array<i32: 4, 1>} : memref<128x32xf32, #tpu.memory_space<vmem>>, vector<32x32xf32>
    %c2 = arith.constant 2 : index
    %c0_15 = arith.constant 0 : index
    %28 = tpu.strided_load %arg6[%c2, %c0_15] {strides = array<i32: 4, 1>} : memref<128x32xf32, #tpu.memory_space<vmem>>, vector<32x32xf32>
    %c3 = arith.constant 3 : index
    %c0_16 = arith.constant 0 : index
    %29 = tpu.strided_load %arg6[%c3, %c0_16] {strides = array<i32: 4, 1>} : memref<128x32xf32, #tpu.memory_space<vmem>>, vector<32x32xf32>
    %30 = tpu.concatenate %26, %27, %28, %29 in 1 : vector<32x32xf32>, vector<32x32xf32>, vector<32x32xf32>, vector<32x32xf32> -> vector<32x128xf32>
    %c0_17 = arith.constant 0 : index
    %c0_18 = arith.constant 0 : index
    %c0_19 = arith.constant 0 : index
    %31 = vector.load %arg5[%c0_17, %c0_18, %c0_19] : memref<1x32x128xf32, #tpu.memory_space<vmem>>, vector<1x32x128xf32>
    %32 = vector.shape_cast %31 : vector<1x32x128xf32> to vector<32x128xf32>
    %33 = vector.shape_cast %30 : vector<32x128xf32> to vector<1x32x128xf32>
    tpu.vector_store %arg5[%c0_17, %c0_18, %c0_19], %33 {strides = array<i32>} : memref<1x32x128xf32, #tpu.memory_space<vmem>>, vector<1x32x128xf32>,
    return
  }
  func.func @transform_0(%arg0: i32, %arg1: i32) -> (i32, i32, i32) {
    %c0_i32 = arith.constant 0 : i32
    %c0_i32_0 = arith.constant 0 : i32
    return %arg0, %c0_i32, %arg1 : i32, i32, i32
  }
  func.func @transform_1(%arg0: i32, %arg1: i32) -> (i32, i32) {
    %c0_i32 = arith.constant 0 : i32
    %c0_i32_0 = arith.constant 0 : i32
    %c0_i32_1 = arith.constant 0 : i32
    return %c0_i32, %c0_i32_0 : i32, i32
  }
  func.func @transform_2(%arg0: i32, %arg1: i32) -> (i32, i32) {
    %c0_i32 = arith.constant 0 : i32
    %c0_i32_0 = arith.constant 0 : i32
    %c0_i32_1 = arith.constant 0 : i32
    return %c0_i32, %c0_i32_0 : i32, i32
  }
  func.func @transform_3(%arg0: i32, %arg1: i32) -> (i32, i32, i32) {
    %c0_i32 = arith.constant 0 : i32
    %c0_i32_0 = arith.constant 0 : i32
    return %arg0, %arg1, %c0_i32 : i32, i32, i32
  }
}

</mosaic_0001>

<bundles_post_ra>
// kernel: tpu_custom_call.1
= control target key start
LH: loop header
LB: loop body
LE: loop exit
PB: predicated region body
PF: predicated region fallthrough
CT: control target
= control target key end

     0   :  { %8 = vsyncpa [#allocation4], 0  ;;  %s912_s0 = inlined_call_operand.vmem [shape: f32[2,32,128], index: 0, kind: input, shape index: {}]   ;;  %s913_s1 = inlined_call_operand.vmem [shape: f32[32,1], index: 1, kind: input, shape index: {}]   ;;  %s914_s2 = inlined_call_operand.vmem [shape: f32[32,1], index: 2, kind: input, shape index: {}]   ;;  %s915_s3 = inlined_call_operand.hbm [shape: f32[2,32,128], index: 3, kind: output, shape index: {}]  }
   0x1   :  { %10 = vsyncpa [#allocation4 + $0x1], 0  ;;  %s740_s12 = smov 0   ;;  %s742_s13 = smov 0  }
   0x2   :  { %s744_s14 = smov 0   ;;  %s746_s15 = smov 0  }
   0x3   :  { %s748_s16 = smov 0   ;;  %s750_s17 = smov 0  }
   0x4 LB: > { %s548_s18 = sadd.s32 4294967295, %s711_s17   ;;  %s549_s19 = sadd.s32 4294967294, %s711_s17   ;;  %s711_s17 = sphi %s750_s17, %s16_s17   ;;  %s707_s16 = sphi %s748_s16, %s922_s16   ;;  %s703_s15 = sphi %s746_s15, %s921_s15   ;;  %s699_s14 = sphi %s744_s14, %s920_s14   ;;  %s695_s13 = sphi %s742_s13, %s919_s13   ;;  %s691_s12 = sphi %s740_s12, %s918_s12  }
   0x5   : > { %s28_s20 = sadd.s32 1, %s707_s16  ;;  %s107_s21 = sadd.s32 1, %s699_s14 }
   0x6   : > { %p30_p0 = scmp.ge.s32.totalorder %s28_s20, 2  ;;  %p117_p1 = scmp.ne.s32.totalorder %s699_s14, %s695_s13 }
   0x7   : > { %p118_p2 = scmp.eq.s32.totalorder %s548_s18, 1  ;;  %p123_p3 = scmp.ne.s32.totalorder %s695_s13, %s691_s12 }
   0x8   : > { %s924_s20 = smov (%p30_p0, %s28_s20), 0  ;;  %p124_p5 = scmp.eq.s32.totalorder %s549_s19, 1 }
   0x9   : > { %p780_p4 = por %p118_p2, %p117_p1  ;;  %s102_s23 = ssub.s32 %s707_s16, %s924_s20 }
   0xa   : > { %p552_p6 = scmp.ge.s32.totalorder %s711_s17, 1  ;;  %p105_p7 = scmp.eq.s32.totalorder %s102_s23, 0 }
   0xb   : > { %p787_p8 = por %p124_p5, %p123_p3  ;;  %p159_p9 = scmp.lt.s32.totalorder %s711_s17, 3 }
   0xc   : > { %s793_s25 = scalar_select %p105_p7, %s699_s14, %s107_s21  }
   0xd   : > { %p160_p10 = pnand %p552_p6, %p159_p9 }
   0xe   : > { %p186_p11 = scmp.lt.s32.totalorder (!%p160_p10), %s703_s15, 1  ;;  %s715_s30 = smov (!%p160_p10), 32  }
   0xf   : > { %163 = sbr.rel (%p160_p10) target bundleno = 559 (0x22f), region = 32  ;;  %s716_s4 = smov (!%p160_p10), 64  }
  0x10   : > { %s717_s5 = smov (!%p160_p10), 96   ;;  %s183_s6 = sand.u32 (!%p160_p10), 1, %s695_s13  }
  0x11   : > { %s553_s7 = sshll.u32 (!%p160_p10), %s183_s6, 5 }
  0x12   : > { %s858_s8 = scalar_lea.vmem (!%p160_p10), [#allocation3], %s553_s7 }
  0x13   : > { %s466_s19 = sshll.u32 (!%p160_p10), %s858_s8, 4  ;;  %s467_s19 = int_to_ptr.vmem [resolvable:$true] %s466_s19 }
  0x14   : > { %v203_v0 = vld [vmem:[%s914_s2] sm:$0xff]  ;;  %v713_v2 = vmov 0   ;;  %v201_v3 = vld [vmem:[%s913_s1 + $0x10] sm:$0xff]  ;;  %v204_v4 = vld [vmem:[%s914_s2 + $0x8] sm:$0xff]  ;;  %s187_s9 = scalar_select %p186_p11, %s703_s15, 1  ;;  %v714_v13 = vmov 32.0  }
  0x15   : > { %v199_v1 = vld [vmem:[%s913_s1] sm:$0xff]  ;;  %627 = vset.pattern.permute.xlu1 %v713_v2  ;;  %626 = vset.pattern.permute.xlu0 %v713_v2  ;;  %v200_v5 = vld [vmem:[%s913_s1 + $0x8] sm:$0xff]  ;;  %v205_v6 = vld [vmem:[%s914_s2 + $0x10] sm:$0xff]  ;;  %629 = vrcp.f32 %v714_v13  ;;  %vm337_vm4 = vcmask 261120   ;;  %vm437_vm5 = vcmask 523264   ;;  %vm442_vm6 = vcmask 785408  }
  0x16   : > { %283 = vperm.xlu1 %627, %v203_v0   ;;  %259 = vperm.xlu0 %626, %v199_v1   ;;  %s561_s18 = sshll.u32 %s187_s9, 5  ;;  %v206_v7 = vld [vmem:[%s914_s2 + $0x18] sm:$0xff]  ;;  %s562_s9 = sshll.u32 %s703_s15, 5 }
  0x17   : > { %628 = vset.pattern.permute.xlu2 %v713_v2  ;;  %v202_v8 = vld [vmem:[%s913_s1 + $0x18] sm:$0xff]  ;;  %s193_s29 = scalar_lea.vmem %s912_s0, %s561_s18  ;;  %s465_s18 = scalar_lea.hbm %s915_s3, %s562_s9 }
  0x18   : > { %269 = vperm.xlu2 %628, %v201_v3   ;;  %v195_v9 = vld [vmem:[%s193_s29] sm:$0xff]  ;;  %v196_v10 = vld [vmem:[%s193_s29 + $0x8] sm:$0xff]  ;;  %v197_v12 = vld [vmem:[%s193_s29 + $0x10] sm:$0xff]  ;;  %s468_s21 = sshll.u32 %s465_s18, 4  ;;  %s452_s15 = scalar_lea.sflag [#allocation4], %s183_s6  ;;  %s469_s21 = int_to_ptr.hbm [resolvable:$true] %s468_s21 }
  0x19   : > { %v207_v11 = vadd.f32 %v196_v10, %v195_v9  ;;  %v198_v15 = vld [vmem:[%s193_s29 + $0x18] sm:$0xff]  ;;  %s647_s23 = sshra.s32 %s469_s21, 4  ;;  %s653_s29 = scalar_lea.hbm %s915_s3, 64  ;;  %s648_s23 = int_to_ptr.hbm [resolvable:$true] %s647_s23 }
  0x1a   : > { %s649_s26 = scalar_lea.hbm %s648_s23, 32  ;;  %p654_p1 = scmp.lt.s32.totalorder %s648_s23, %s915_s3 }
  0x1b   : > { %v208_v14 = vadd.f32 %v207_v11, %v197_v12  ;;  %v630_v18 = vpop.eup %629  ;;  %p650_p12 = scmp.ne.s32.totalorder %s648_s23, %s649_s26  ;;  %p655_p2 = scmp.lt.s32.totalorder %s653_s29, %s649_s26 }
  0x1c   : > { %v217_v20 = vmul.f32 32.0, %v630_v18  ;;  %vm221_vm0 = vweird.f32 %v630_v18 }
  0x1d   : > { %v209_v16 = vadd.f32 %v208_v14, %v198_v15  ;;  %p651_p13 = pnand %p650_p12, %p780_p4  ;;  %p656_p3 = por %p655_p2, %p654_p1 }
  0x1e   : > { %288 = vperm.xlu1 %627, %v204_v4   ;;  %264 = vperm.xlu0 %626, %v200_v5   ;;  %v218_v22 = vsub.f32 1.0, %v217_v20 }
  0x1f   : > { %v210_v17 = vrot.slane %v209_v16, 4  ;;  %p652_p0 = pneg %p651_p13 }
  0x20   : > { %293 = vperm.xlu2 %628, %v205_v6   ;;  %v219_v24 = vmul.f32 %v630_v18, %v218_v22 }
  0x21   : > { %v211_v19 = vadd.f32 %v210_v17, %v209_v16  ;;  %p657_p5 = pnand %p656_p3, %p652_p0 }
  0x22   : > { %v220_v26 = vadd.f32 %v630_v18, %v219_v24 }
  0x23   : > { %v212_v21 = vrot.slane %v211_v19, 2 }
  0x24   : > { %v222_v28 = vsel %vm221_vm0, %v630_v18, %v220_v26 }
  0x25   : > { %v213_v23 = vadd.f32 %v212_v21, %v211_v19 }
  0x26   : > { %298 = vperm.xlu1 %627, %v206_v7   ;;  %274 = vperm.xlu0 %626, %v202_v8  }
  0x27   : > { %v214_v25 = vrot.slane %v213_v23, 1 }
  0x29   : > { %v215_v27 = vadd.f32 %v214_v25, %v213_v23 }
  0x2b   : > { %v223_v29 = vmul.f32 %v222_v28, %v215_v27 }
  0x2d   : > { %v224_v30 = vsub.f32 %v195_v9, %v223_v29  ;;  %v225_v31 = vsub.f32 %v196_v10, %v223_v29  ;;  %v226_v32 = vsub.f32 %v197_v12, %v223_v29  ;;  %v227_v35 = vsub.f32 %v198_v15, %v223_v29 }
  0x2f   : > { %v228_v33 = vmul.f32 %v224_v30, %v224_v30  ;;  %v229_v34 = vmul.f32 %v225_v31, %v225_v31  ;;  %v230_v36 = vmul.f32 %v226_v32, %v226_v32  ;;  %v231_v38 = vmul.f32 %v227_v35, %v227_v35 }
  0x31   : > { %v232_v37 = vadd.f32 %v229_v34, %v228_v33 }
  0x33   : > { %v233_v39 = vadd.f32 %v232_v37, %v230_v36 }
  0x35   : > { %v234_v40 = vadd.f32 %v233_v39, %v231_v38 }
  0x37   : > { %v235_v41 = vrot.slane %v234_v40, 4 }
  0x39   : > { %v236_v42 = vadd.f32 %v235_v41, %v234_v40 }
  0x3b   : > { %v237_v43 = vrot.slane %v236_v42, 2 }
  0x3d   : > { %v238_v44 = vadd.f32 %v237_v43, %v236_v42 }
  0x3f   : > { %v239_v45 = vrot.slane %v238_v44, 1 }
  0x41   : > { %v240_v46 = vadd.f32 %v239_v45, %v238_v44 }
  0x43   : > { %v241_v47 = vmul.f32 %v240_v46, %v222_v28 }
  0x45   : > { %v242_v48 = vadd.f32 1e-05, %v241_v47 }
  0x47   : > { %631 = vrsqrt.f32 %v242_v48  ;;  %vm249_vm1 = vweird.f32 %v242_v48 }
  0x4d   : > { %v632_v49 = vpop.eup %631 }
  0x4e   : > { %v244_v50 = vmul.f32 %v632_v49, %v242_v48  ;;  %vm250_vm2 = vweird.f32 %v632_v49 }
  0x4f   : > { %vm251_vm3 = vmor %vm249_vm1, %vm250_vm2 }
  0x50   : > { %v245_v51 = vmul.f32 %v632_v49, %v244_v50 }
  0x52   : > { %v246_v52 = vmul.f32 0.5, %v245_v51 }
  0x54   : > { %v247_v53 = vsub.f32 1.5, %v246_v52 }
  0x56   : > { %v248_v54 = vmul.f32 %v632_v49, %v247_v53 }
  0x58   : > { %v252_v55 = vsel %vm251_vm3, %v632_v49, %v248_v54 }
  0x59   : > { %v253_v56 = vmul.f32 %v252_v55, %v224_v30  ;;  %v254_v61 = vmul.f32 %v252_v55, %v225_v31  ;;  %v255_v2 = vmul.f32 %v252_v55, %v226_v32  ;;  %v256_v7 = vmul.f32 %v252_v55, %v227_v35 }
  0x72   : > { %v270_v62 = vpop.permute.xlu2 %269 }
  0x73   : > { %v279_v4 = vmul.f32 %v270_v62, %v255_v2 }
  0x7a   : > { %v294_v5 = vpop.permute.xlu2 %293 }
  0x7b   : > { %v303_v6 = vadd.f32 %v294_v5, %v279_v4 }
  0x88   : > { %v284_v57 = vpop.permute.xlu1 %283  ;;  %v260_v58 = vpop.permute.xlu0 %259 }
  0x89   : > { %v277_v59 = vmul.f32 %v260_v58, %v253_v56 }
  0x8b   : > { %v301_v60 = vadd.f32 %v284_v57, %v277_v59 }
  0x8d   : > { %305 = vxpose.xlu2.b32.start [1/4] (short) %v301_v60, 128 }
  0x90   : > { %v265_v63 = vpop.permute.xlu0 %264  ;;  %v289_v1 = vpop.permute.xlu1 %288 }
  0x91   : > { %v278_v0 = vmul.f32 %v265_v63, %v254_v61 }
  0x93   : > { %v302_v3 = vadd.f32 %v289_v1, %v278_v0 }
  0x95   : > { %306 = vxpose.xlu2.b32.cont [2/4] (short) %v302_v3, 128 }
  0x98   : > { %v275_v8 = vpop.permute.xlu0 %274  ;;  %v299_v10 = vpop.permute.xlu1 %298 }
  0x99   : > { %v280_v9 = vmul.f32 %v275_v8, %v256_v7 }
  0x9b   : > { %v304_v11 = vadd.f32 %v299_v10, %v280_v9 }
  0x9d   : > { %307 = vxpose.xlu2.b32.cont [3/4] (short) %v303_v6, 128 }
  0xa5   : > { %308 = vxpose.xlu2.b32.end [4/4] (short) %v304_v11, 128 }
 0x126   : > { %v321_v12 = vpop.trf.xlu2 }
 0x127   : > { %338 = vst.msk [vmem:[#allocation2] sm:$0xff] %vm337_vm4, %v321_v12 }
 0x12e   : > { %v322_v13 = vpop.trf.xlu2 }
 0x12f   : > { %339 = vst.msk [vmem:[#allocation2 + $0x8] sm:$0xff] %vm337_vm4, %v322_v13 }
 0x136   : > { %v323_v14 = vpop.trf.xlu2 }
 0x137   : > { %340 = vst.msk [vmem:[#allocation2 + $0x10] sm:$0xff] %vm337_vm4, %v323_v14 }
 0x13e   : > { %v324_v15 = vpop.trf.xlu2 }
 0x13f   : > { %341 = vst.msk [vmem:[#allocation2 + $0x18] sm:$0xff] %vm337_vm4, %v324_v15 }
 0x146   : > { %v325_v16 = vpop.trf.xlu2  ;;  %v362_v17 = vld [vmem:[#allocation2 + $0x1] ss:$4 sm:$0xff]  ;;  %v370_v19 = vld [vmem:[#allocation2 + $0x2] ss:$4 sm:$0xff]  ;;  %v378_v21 = vld [vmem:[#allocation2 + $0x3] ss:$4 sm:$0xff] }
 0x147   : > { %342 = vst.msk [vmem:[#allocation2 + $0x20] sm:$0xff] %vm337_vm4, %v325_v16  ;;  %389 = vrot.lane.b32.xlu0 %v362_v17, %s715_s30  ;;  %v354_v42 = vld [vmem:[#allocation2] ss:$4 sm:$0xff] }
 0x14e   : > { %v326_v18 = vpop.trf.xlu2 }
 0x14f   : > { %343 = vst.msk [vmem:[#allocation2 + $0x28] sm:$0xff] %vm337_vm4, %v326_v18  ;;  %405 = vrot.lane.b32.xlu0 %v370_v19, %s716_s4 }
 0x156   : > { %v327_v20 = vpop.trf.xlu2 }
 0x157   : > { %344 = vst.msk [vmem:[#allocation2 + $0x30] sm:$0xff] %vm337_vm4, %v327_v20  ;;  %421 = vrot.lane.b32.xlu0 %v378_v21, %s717_s5 }
 0x15e   : > { %v328_v22 = vpop.trf.xlu2 }
 0x15f   : > { %345 = vst.msk [vmem:[#allocation2 + $0x38] sm:$0xff] %vm337_vm4, %v328_v22 }
 0x166   : > { %v329_v23 = vpop.trf.xlu2  ;;  %v364_v24 = vld [vmem:[#allocation2 + $0x21] ss:$4 sm:$0xff]  ;;  %v372_v26 = vld [vmem:[#allocation2 + $0x22] ss:$4 sm:$0xff]  ;;  %v380_v28 = vld [vmem:[#allocation2 + $0x23] ss:$4 sm:$0xff] }
 0x167   : > { %346 = vst.msk [vmem:[#allocation2 + $0x40] sm:$0xff] %vm337_vm4, %v329_v23  ;;  %391 = vrot.lane.b32.xlu1 %v364_v24, %s715_s30  ;;  %v356_v49 = vld [vmem:[#allocation2 + $0x20] ss:$4 sm:$0xff] }
 0x16e   : > { %v330_v25 = vpop.trf.xlu2 }
 0x16f   : > { %347 = vst.msk [vmem:[#allocation2 + $0x48] sm:$0xff] %vm337_vm4, %v330_v25  ;;  %407 = vrot.lane.b32.xlu1 %v372_v26, %s716_s4 }
 0x176   : > { %v331_v27 = vpop.trf.xlu2 }
 0x177   : > { %348 = vst.msk [vmem:[#allocation2 + $0x50] sm:$0xff] %vm337_vm4, %v331_v27  ;;  %423 = vrot.lane.b32.xlu1 %v380_v28, %s717_s5 }
 0x17e   : > { %v332_v29 = vpop.trf.xlu2 }
 0x17f   : > { %349 = vst.msk [vmem:[#allocation2 + $0x58] sm:$0xff] %vm337_vm4, %v332_v29 }
 0x186   : > { %v333_v30 = vpop.trf.xlu2  ;;  %v366_v31 = vld [vmem:[#allocation2 + $0x41] ss:$4 sm:$0xff]  ;;  %v374_v33 = vld [vmem:[#allocation2 + $0x42] ss:$4 sm:$0xff]  ;;  %v382_v35 = vld [vmem:[#allocation2 + $0x43] ss:$4 sm:$0xff] }
 0x187   : > { %350 = vst.msk [vmem:[#allocation2 + $0x60] sm:$0xff] %vm337_vm4, %v333_v30  ;;  %393 = vrot.lane.b32.xlu0 %v366_v31, %s715_s30  ;;  %v358_v56 = vld [vmem:[#allocation2 + $0x40] ss:$4 sm:$0xff] }
 0x18e   : > { %v334_v32 = vpop.trf.xlu2 }
 0x18f   : > { %351 = vst.msk [vmem:[#allocation2 + $0x68] sm:$0xff] %vm337_vm4, %v334_v32  ;;  %409 = vrot.lane.b32.xlu0 %v374_v33, %s716_s4 }
 0x196   : > { %v335_v34 = vpop.trf.xlu2 }
 0x197   : > { %352 = vst.msk [vmem:[#allocation2 + $0x70] sm:$0xff] %vm337_vm4, %v335_v34  ;;  %425 = vrot.lane.b32.xlu0 %v382_v35, %s717_s5 }
 0x19e   : > { %v336_v36 = vpop.trf.xlu2 }
 0x19f   : > { %353 = vst.msk [vmem:[#allocation2 + $0x78] sm:$0xff] %vm337_vm4, %v336_v36 }
 0x1a6   : > { %v368_v37 = vld [vmem:[#allocation2 + $0x61] ss:$4 sm:$0xff]  ;;  %v376_v38 = vld [vmem:[#allocation2 + $0x62] ss:$4 sm:$0xff]  ;;  %v384_v39 = vld [vmem:[#allocation2 + $0x63] ss:$4 sm:$0xff] }
 0x1a7   : > { %395 = vrot.lane.b32.xlu1 %v368_v37, %s715_s30  ;;  %v360_v63 = vld [vmem:[#allocation2 + $0x60] ss:$4 sm:$0xff] }
 0x1af   : > { %411 = vrot.lane.b32.xlu1 %v376_v38, %s716_s4 }
 0x1b7   : > { %427 = vrot.lane.b32.xlu1 %v384_v39, %s717_s5 }
 0x1b9   : > { %v390_v40 = vpop.permute.xlu0 %389 }
 0x1ba   : > { %v433_v43 = vsel %vm337_vm4, %v354_v42, %v390_v40 }
 0x1c1   : > { %v406_v41 = vpop.permute.xlu0 %405 }
 0x1c2   : > { %v438_v44 = vsel %vm437_vm5, %v433_v43, %v406_v41 }
 0x1c9   : > { %v422_v45 = vpop.permute.xlu0 %421 }
 0x1ca   : > { %v443_v46 = vsel %vm442_vm6, %v438_v44, %v422_v45 }
 0x1cb   : > { %447 = vst [vmem:[%s858_s8] sm:$0xff] %v443_v46 }
 0x1d9   : > { %v392_v47 = vpop.permute.xlu1 %391 }
 0x1da   : > { %v434_v50 = vsel %vm337_vm4, %v356_v49, %v392_v47 }
 0x1e1   : > { %v408_v48 = vpop.permute.xlu1 %407 }
 0x1e2   : > { %v439_v51 = vsel %vm437_vm5, %v434_v50, %v408_v48 }
 0x1e9   : > { %v424_v52 = vpop.permute.xlu1 %423 }
 0x1ea   : > { %v444_v53 = vsel %vm442_vm6, %v439_v51, %v424_v52 }
 0x1eb   : > { %448 = vst [vmem:[%s858_s8 + $0x8] sm:$0xff] %v444_v53 }
 0x1f9   : > { %v394_v54 = vpop.permute.xlu0 %393 }
 0x1fa   : > { %v435_v57 = vsel %vm337_vm4, %v358_v56, %v394_v54 }
 0x201   : > { %v410_v55 = vpop.permute.xlu0 %409 }
 0x202   : > { %v440_v58 = vsel %vm437_vm5, %v435_v57, %v410_v55 }
 0x209   : > { %v426_v59 = vpop.permute.xlu0 %425 }
 0x20a   : > { %v445_v60 = vsel %vm442_vm6, %v440_v58, %v426_v59 }
 0x20b   : > { %449 = vst [vmem:[%s858_s8 + $0x10] sm:$0xff] %v445_v60 }
 0x219   : > { %v396_v61 = vpop.permute.xlu1 %395 }
 0x21a   : > { %v436_v0 = vsel %vm337_vm4, %v360_v63, %v396_v61 }
 0x221   : > { %v412_v62 = vpop.permute.xlu1 %411 }
 0x222   : > { %v441_v1 = vsel %vm437_vm5, %v436_v0, %v412_v62 }
 0x229   : > { %v428_v2 = vpop.permute.xlu1 %427 }
 0x22a   : > { %v446_v3 = vsel %vm442_vm6, %v441_v1, %v428_v2 }
 0x22b   : > { %450 = vst [vmem:[%s858_s8 + $0x18] sm:$0xff] %v446_v3 }
 0x22c   : > { %660 = shalt.err (!%p657_p5)
}
 0x22d   : > { %s718_s5 = smov 128   ;;  %s719_s6 = smov 8  }
 0x22e   : > { %563 = dma.vmem_to_hbm [thread:$0]  (%p780_p4), %s467_s19, 512, %s469_s21, %s452_s15, %s718_s5, %s718_s5, %s719_s6  }
 0x22f PF: > { %p569_p6 = scmp.ge.s32.totalorder %s711_s17, 2  ;;  %s483_s7 = sand.u32 1, %s691_s12  }
 0x230   : > { %s484_s8 = scalar_lea.sflag [#allocation4], %s483_s7 }
 0x231   : > { %p566_p7 = pnand %p569_p6, %p787_p8 }
 0x233   : > { %p567_p9 = pneg %p566_p7 }
 0x235   : > { %686 = dma.done.wait (%p567_p9), %s484_s8, 512  }
 0x236   : > { %688 = vsyncadd (%p567_p9), %s484_s8, 4294966784  ;;  %s16_s17 = sadd.s32 1, %s711_s17   ;;  %s918_s12 = smov %s695_s13 }
 0x237   : > { %p13_p10 = scmp.ge.s32.totalorder %s16_s17, 4   ;;  %s919_s13 = smov %s699_s14 }
 0x238   : > { %s920_s14 = smov %s793_s25  ;;  %s921_s15 = smov %s707_s16 }
 0x239   : > { %s922_s16 = smov %s924_s20  ;;  %15 = sbr.rel (!%p13_p10) target bundleno = 4 (0x4), region = 82 }
 0x23e   :  { %490 = vsyncpa [#allocation4], 1 }
 0x23f   :  { %492 = vsyncpa [#allocation4 + $0x1], 1 }

</bundles_post_ra>
